<compile_context>
chip_gen: v5e
topology: v5e:2x2
jax: 0.10.0
libtpu: 0.0.40
codegen_flags: <defaults>
</compile_context>

<pallas_src>
import functools

import jax
import jax.numpy as jnp
from jax.experimental import pallas as pl
from jax.experimental.pallas import tpu as pltpu


_VMEM_LIMIT = 48 * 1024 * 1024  # explicit scoped-VMEM budget, safe on v5e/v6e/v7x


def _round_up(x, m):
    return ((x + m - 1) // m) * m


def _row_tile(rows, target=512):
    """Row-tile: multiple of 8, <= target, and (when possible) giving >=2 grid steps
    so both v7x TensorCores get work."""
    if rows <= 16:
        return rows
    half = _round_up((rows + 1) // 2, 8)
    return max(8, min(target, half))


# ---------------------------------------------------------------------------
# Pallas kernel 1: per-Fourier-mode complex channel mixing (stacked-real form)
#   For each mode k in the block:  out[k] = [xr|xi] @ [[wr,wi],[-wi,wr]]
#   x block: (Kb, Rt, 2I)   w block: (Kb, 2I, 2O)   out block: (Kb, Rt, 2O) f32
# ---------------------------------------------------------------------------
def _spectral_mix_kernel(x_ref, w_ref, o_ref):
    kb = x_ref.shape[0]
    for k in range(kb):  # static, unrolled over the mode block
        o_ref[k] = jnp.dot(
            x_ref[k], w_ref[k], preferred_element_type=jnp.float32
        ).astype(o_ref.dtype)


def spectral_mix(x2, w2, *, compute_dtype=jnp.bfloat16, block_r=512, block_k=8):
    """x2: (K, R, 2I) real, w2: (K, 2I, 2O) real  ->  (K, R, 2O) f32 = [real | imag]."""
    K, R, I2 = x2.shape
    O2 = w2.shape[2]

    x2 = x2.astype(compute_dtype)
    w2 = w2.astype(compute_dtype)

    kb = K if K <= 1 else min(block_k, (K + 1) // 2)  # >=2 mode steps when K >= 2
    rt = _row_tile(R, block_r)

    Kp = _round_up(K, kb)
    Rp = _round_up(R, rt)
    if (Kp, Rp) != (K, R):
        x2 = jnp.pad(x2, ((0, Kp - K), (0, Rp - R), (0, 0)))
        w2 = jnp.pad(w2, ((0, Kp - K), (0, 0), (0, 0)))

    out = pl.pallas_call(
        _spectral_mix_kernel,
        out_shape=jax.ShapeDtypeStruct((Kp, Rp, O2), jnp.float32),
        grid=(Kp // kb, Rp // rt),
        in_specs=[
            pl.BlockSpec((kb, rt, I2), lambda k, r: (k, r, 0)),
            pl.BlockSpec((kb, I2, O2), lambda k, r: (k, 0, 0)),
        ],
        out_specs=pl.BlockSpec((kb, rt, O2), lambda k, r: (k, r, 0)),
        compiler_params=pltpu.CompilerParams(
            dimension_semantics=("parallel", "parallel"),
            vmem_limit_bytes=_VMEM_LIMIT,
        ),
    )(x2, w2)

    if (Kp, Rp) != (K, R):
        out = out[:K, :R]
    return out


def _stack_complex_weight(w):
    """w: (I, O, K, 2)  ->  (K, 2I, 2O) real block matrix [[wr, wi], [-wi, wr]]."""
    wr = jnp.transpose(w[..., 0], (2, 0, 1))  # (K, I, O)
    wi = jnp.transpose(w[..., 1], (2, 0, 1))
    top = jnp.concatenate([wr, wi], axis=-1)   # (K, I, 2O)
    bot = jnp.concatenate([-wi, wr], axis=-1)  # (K, I, 2O)
    return jnp.concatenate([top, bot], axis=-2)  # (K, 2I, 2O)


# ---------------------------------------------------------------------------
# Pallas kernel 2: fused backcast FFN:  (xx + xy) -> Linear -> ReLU -> Linear
# Hidden activation lives only in VMEM/vregs (no HBM round trip).
# Elementwise math in f32; matmul operands in bf16.
# ---------------------------------------------------------------------------
def _backcast_ffn_kernel(xx_ref, xy_ref, w0_ref, b0_ref, w1_ref, b1_ref, o_ref,
                         *, compute_dtype):
    x = xx_ref[...] + xy_ref[...]                                  # f32 add (folded)
    h = jnp.dot(x.astype(compute_dtype), w0_ref[...],
                preferred_element_type=jnp.float32) + b0_ref[...]
    h = jnp.maximum(h, 0.0)
    y = jnp.dot(h.astype(compute_dtype), w1_ref[...],
                preferred_element_type=jnp.float32) + b1_ref[...]
    o_ref[...] = y.astype(o_ref.dtype)


def fused_backcast_ffn(xx, xy, w0, b0, w1, b1, *, compute_dtype=jnp.bfloat16,
                       block_r=512):
    R, O = xx.shape
    H = w0.shape[1]
    Dout = w1.shape[1]

    tm = _row_tile(R, block_r)
    Rp = _round_up(R, tm)
    if Rp != R:  # pad rows (masked-tile equivalent); no more "one giant block" fallback
        xx = jnp.pad(xx, ((0, Rp - R), (0, 0)))
        xy = jnp.pad(xy, ((0, Rp - R), (0, 0)))

    w0c = w0.astype(compute_dtype)
    w1c = w1.astype(compute_dtype)
    b0r = b0.reshape(1, H).astype(jnp.float32)
    b1r = b1.reshape(1, Dout).astype(jnp.float32)

    out = pl.pallas_call(
        functools.partial(_backcast_ffn_kernel, compute_dtype=compute_dtype),
        out_shape=jax.ShapeDtypeStruct((Rp, Dout), jnp.float32),
        grid=(Rp // tm,),
        in_specs=[
            pl.BlockSpec((tm, O), lambda i: (i, 0)),
            pl.BlockSpec((tm, O), lambda i: (i, 0)),
            pl.BlockSpec((O, H), lambda i: (0, 0)),
            pl.BlockSpec((1, H), lambda i: (0, 0)),
            pl.BlockSpec((H, Dout), lambda i: (0, 0)),
            pl.BlockSpec((1, Dout), lambda i: (0, 0)),
        ],
        out_specs=pl.BlockSpec((tm, Dout), lambda i: (i, 0)),
        compiler_params=pltpu.CompilerParams(
            dimension_semantics=("parallel",),
            vmem_limit_bytes=_VMEM_LIMIT,
        ),
    )(xx, xy, w0c, b0r, w1c, b1r)

    return out[:R] if Rp != R else out


# ---------------------------------------------------------------------------
# Forward pass (mode='full', use_fork=False)
# ---------------------------------------------------------------------------
def spectral_conv2d_forward(x, params, *, compute_dtype=jnp.bfloat16):
    """x: (B, M, N, I) float32.  Returns (backcast, None)."""
    B, M, N, I = x.shape
    O = params["w1"].shape[1]
    K = params["w1"].shape[2]  # n_modes

    xp = jnp.transpose(x, (0, 3, 1, 2))  # (B, I, M, N)

    # ----- dimension 2 (y / last axis) -----
    x_fty = jnp.fft.rfft(xp, axis=-1, norm="ortho")                 # (B,I,M,N//2+1) c64
    xk = jnp.transpose(x_fty[..., :K], (3, 0, 2, 1)).reshape(K, B * M, I)  # complex
    x2 = jnp.concatenate([jnp.real(xk), jnp.imag(xk)], axis=-1)     # (K, B*M, 2I)
    out2 = spectral_mix(x2, _stack_complex_weight(params["w1"]),
                        compute_dtype=compute_dtype)                # (K, B*M, 2O) f32
    oc = (out2[..., :O] + 1j * out2[..., O:]).reshape(K, B, M, O)
    oc = jnp.transpose(oc, (1, 3, 2, 0))                            # (B, O, M, K)
    # TODO(synk): write the mix output straight into the zero-padded spectrum via
    # out_specs index_map + input_output_aliases instead of zeros().at[].set().
    out_ft = jnp.zeros((B, O, M, N // 2 + 1), jnp.complex64).at[..., :K].set(oc)
    xy = jnp.fft.irfft(out_ft, n=N, axis=-1, norm="ortho")          # (B, O, M, N)

    # ----- dimension 1 (x / second-to-last axis) -----
    x_ftx = jnp.fft.rfft(xp, axis=-2, norm="ortho")                 # (B,I,M//2+1,N)
    xk = jnp.transpose(x_ftx[:, :, :K, :], (2, 0, 3, 1)).reshape(K, B * N, I)
    x2 = jnp.concatenate([jnp.real(xk), jnp.imag(xk)], axis=-1)     # (K, B*N, 2I)
    out2 = spectral_mix(x2, _stack_complex_weight(params["w2"]),
                        compute_dtype=compute_dtype)                # (K, B*N, 2O) f32
    oc = (out2[..., :O] + 1j * out2[..., O:]).reshape(K, B, N, O)
    oc = jnp.transpose(oc, (1, 3, 0, 2))                            # (B, O, K, N)
    out_ft = jnp.zeros((B, O, M // 2 + 1, N), jnp.complex64).at[:, :, :K, :].set(oc)
    xx = jnp.fft.irfft(out_ft, n=M, axis=-2, norm="ortho")          # (B, O, M, N)

    # xx + xy add is folded INTO the fused FFN kernel (one fewer HBM pass).
    # TODO(synk): fold the channels-last transpose itself into the FFN kernel
    # (requires an in-kernel XLU transpose of the channel axis).
    xx_t = jnp.transpose(xx, (0, 2, 3, 1)).reshape(B * M * N, O)
    xy_t = jnp.transpose(xy, (0, 2, 3, 1)).reshape(B * M * N, O)

    b_out = fused_backcast_ffn(
        xx_t, xy_t, params["ff_w0"], params["ff_b0"],
        params["ff_w1"], params["ff_b1"], compute_dtype=compute_dtype,
    ).reshape(B, M, N, O)

    # use_fork=False -> forecast branch is None
    # TODO(synk): forecast_ff branch (use_fork=True) would reuse fused_backcast_ffn.
    # TODO(synk): for tiny in/out dims (<=16) a lane-dense VPU broadcast-FMA mix
    # (spatial axis on lanes) would beat the MXU path used here.
    return b_out, None


# ---------------------------------------------------------------------------
# Pure-JAX reference (f32) for sanity check
# ---------------------------------------------------------------------------
def reference_forward(x, params):
    B, M, N, I = x.shape
    O = params["w1"].shape[1]
    K = params["w1"].shape[2]
    xp = jnp.transpose(x, (0, 3, 1, 2))
    w1 = params["w1"][..., 0] + 1j * params["w1"][..., 1]
    w2 = params["w2"][..., 0] + 1j * params["w2"][..., 1]

    x_fty = jnp.fft.rfft(xp, axis=-1, norm="ortho")
    out_ft = jnp.zeros((B, O, M, N // 2 + 1), dtype=jnp.complex64)
    out_ft = out_ft.at[:, :, :, :K].set(
        jnp.einsum("bixy,ioy->boxy", x_fty[:, :, :, :K], w1))
    xy = jnp.fft.irfft(out_ft, n=N, axis=-1, norm="ortho")

    x_ftx = jnp.fft.rfft(xp, axis=-2, norm="ortho")
    out_ft = jnp.zeros((B, O, M // 2 + 1, N), dtype=jnp.complex64)
    out_ft = out_ft.at[:, :, :K, :].set(
        jnp.einsum("bixy,iox->boxy", x_ftx[:, :, :K, :], w2))
    xx = jnp.fft.irfft(out_ft, n=M, axis=-2, norm="ortho")

    x_out = jnp.transpose(xx + xy, (0, 2, 3, 1)).reshape(B * M * N, O)
    h = jnp.maximum(x_out @ params["ff_w0"] + params["ff_b0"], 0.0)
    h = h @ params["ff_w1"] + params["ff_b1"]
    return h.reshape(B, M, N, O)


# ---------------------------------------------------------------------------
# Deterministic parameter construction
# ---------------------------------------------------------------------------
def make_params(key, in_dim, out_dim, n_modes, factor):
    k1, k2, k3, k4 = jax.random.split(key, 4)
    # xavier_normal_ std for a (in_dim, out_dim, n_modes, 2) tensor (PyTorch fan rule)
    fan_in = out_dim * n_modes * 2
    fan_out = in_dim * n_modes * 2
    std = (2.0 / (fan_in + fan_out)) ** 0.5
    hidden = out_dim * factor
    return {
        "w1": std * jax.random.normal(k1, (in_dim, out_dim, n_modes, 2), jnp.float32),
        "w2": std * jax.random.normal(k2, (in_dim, out_dim, n_modes, 2), jnp.float32),
        "ff_w0": 0.1 * jax.random.normal(k3, (out_dim, hidden), jnp.float32),
        "ff_b0": jnp.zeros((hidden,), jnp.float32),
        "ff_w1": 0.1 * jax.random.normal(k4, (hidden, out_dim), jnp.float32),
        "ff_b1": jnp.zeros((out_dim,), jnp.float32),
    }


if __name__ == "__main__":
    B, M, N = 2, 16, 16
    in_dim = out_dim = 4
    n_modes = 4
    factor = 2

    key = jax.random.PRNGKey(0)
    kx, kp = jax.random.split(key)
    x = jax.random.normal(kx, (B, M, N, in_dim), jnp.float32)  # layout: b m n i
    params = make_params(kp, in_dim, out_dim, n_modes, factor)

    backcast, forecast = jax.jit(spectral_conv2d_forward)(x, params)
    backcast = jax.block_until_ready(backcast)

    ref = reference_forward(x, params)
    assert backcast.shape == (B, M, N, out_dim)
    assert forecast is None
    # bf16 matmul operands (f32 accumulate / f32 elementwise) -> modest tolerance
    assert jnp.allclose(backcast, ref, atol=2e-2, rtol=2e-2), "mismatch vs reference"

    print("KERNEL_OK")
</pallas_src>

<mosaic_0001>
module attributes {stable_mosaic.version = 11 : i64} {
  func.func @_spectral_mix_kernel(%arg0: i32, %arg1: i32, %arg2: memref<2x16x8xbf16, #tpu.memory_space<vmem>>, %arg3: memref<2x8x8xbf16, #tpu.memory_space<vmem>>, %arg4: memref<2x16x8xf32, #tpu.memory_space<vmem>>) attributes {dimension_semantics = [#tpu.dimension_semantics<parallel>, #tpu.dimension_semantics<parallel>], iteration_bounds = array<i64: 2, 2>, scalar_prefetch = 0 : i64, scratch_operands = 0 : i64, tpu.core_type = #tpu.core_type<tc>, window_params = [{transform_indices = @transform_0, window_bounds = array<i64: 2, 16, 8>}, {transform_indices = @transform_1, window_bounds = array<i64: 2, 8, 8>}, {transform_indices = @transform_2, window_bounds = array<i64: 2, 16, 8>}]} {
    %c0 = arith.constant 0 : index
    %c0_0 = arith.constant 0 : index
    %c0_1 = arith.constant 0 : index
    %0 = vector.load %arg2[%c0, %c0_0, %c0_1] : memref<2x16x8xbf16, #tpu.memory_space<vmem>>, vector<1x16x8xbf16>
    %1 = vector.shape_cast %0 : vector<1x16x8xbf16> to vector<16x8xbf16>
    %c0_2 = arith.constant 0 : index
    %c0_3 = arith.constant 0 : index
    %c0_4 = arith.constant 0 : index
    %2 = vector.load %arg3[%c0_2, %c0_3, %c0_4] : memref<2x8x8xbf16, #tpu.memory_space<vmem>>, vector<1x8x8xbf16>
    %3 = vector.shape_cast %2 : vector<1x8x8xbf16> to vector<8x8xbf16>
    %cst = arith.constant dense<0.000000e+00> : vector<16x8xf32>
    %4 = tpu.matmul %1, %3, %cst {dimension_numbers = #tpu.dot_dimension_numbers<[1], [0], [0], [1], [0, 0, 1, 1], [], []>} : vector<16x8xbf16>, vector<8x8xbf16>, vector<16x8xf32> -> vector<16x8xf32>
    %c0_5 = arith.constant 0 : index
    %c0_6 = arith.constant 0 : index
    %c0_7 = arith.constant 0 : index
    %5 = vector.load %arg4[%c0_5, %c0_6, %c0_7] : memref<2x16x8xf32, #tpu.memory_space<vmem>>, vector<1x16x8xf32>
    %6 = vector.shape_cast %5 : vector<1x16x8xf32> to vector<16x8xf32>
    %7 = vector.shape_cast %4 : vector<16x8xf32> to vector<1x16x8xf32>
    tpu.vector_store %arg4[%c0_5, %c0_6, %c0_7], %7 {strides = array<i32>} : memref<2x16x8xf32, #tpu.memory_space<vmem>>, vector<1x16x8xf32>,
    %c1 = arith.constant 1 : index
    %c0_8 = arith.constant 0 : index
    %c0_9 = arith.constant 0 : index
    %8 = vector.load %arg2[%c1, %c0_8, %c0_9] : memref<2x16x8xbf16, #tpu.memory_space<vmem>>, vector<1x16x8xbf16>
    %9 = vector.shape_cast %8 : vector<1x16x8xbf16> to vector<16x8xbf16>
    %c1_10 = arith.constant 1 : index
    %c0_11 = arith.constant 0 : index
    %c0_12 = arith.constant 0 : index
    %10 = vector.load %arg3[%c1_10, %c0_11, %c0_12] : memref<2x8x8xbf16, #tpu.memory_space<vmem>>, vector<1x8x8xbf16>
    %11 = vector.shape_cast %10 : vector<1x8x8xbf16> to vector<8x8xbf16>
    %cst_13 = arith.constant dense<0.000000e+00> : vector<16x8xf32>
    %12 = tpu.matmul %9, %11, %cst_13 {dimension_numbers = #tpu.dot_dimension_numbers<[1], [0], [0], [1], [0, 0, 1, 1], [], []>} : vector<16x8xbf16>, vector<8x8xbf16>, vector<16x8xf32> -> vector<16x8xf32>
    %c1_14 = arith.constant 1 : index
    %c0_15 = arith.constant 0 : index
    %c0_16 = arith.constant 0 : index
    %13 = vector.load %arg4[%c1_14, %c0_15, %c0_16] : memref<2x16x8xf32, #tpu.memory_space<vmem>>, vector<1x16x8xf32>
    %14 = vector.shape_cast %13 : vector<1x16x8xf32> to vector<16x8xf32>
    %15 = vector.shape_cast %12 : vector<16x8xf32> to vector<1x16x8xf32>
    tpu.vector_store %arg4[%c1_14, %c0_15, %c0_16], %15 {strides = array<i32>} : memref<2x16x8xf32, #tpu.memory_space<vmem>>, vector<1x16x8xf32>,
    return
  }
  func.func @transform_0(%arg0: i32, %arg1: i32) -> (i32, i32, i32) {
    %c0_i32 = arith.constant 0 : i32
    %c0_i32_0 = arith.constant 0 : i32
    return %arg0, %arg1, %c0_i32 : i32, i32, i32
  }
  func.func @transform_1(%arg0: i32, %arg1: i32) -> (i32, i32, i32) {
    %c0_i32 = arith.constant 0 : i32
    %c0_i32_0 = arith.constant 0 : i32
    %c0_i32_1 = arith.constant 0 : i32
    return %arg0, %c0_i32, %c0_i32_0 : i32, i32, i32
  }
  func.func @transform_2(%arg0: i32, %arg1: i32) -> (i32, i32, i32) {
    %c0_i32 = arith.constant 0 : i32
    %c0_i32_0 = arith.constant 0 : i32
    return %arg0, %arg1, %c0_i32 : i32, i32, i32
  }
}

module attributes {stable_mosaic.version = 11 : i64} {
  func.func @_backcast_ffn_kernel(%arg0: i32, %arg1: memref<256x4xf32, #tpu.memory_space<vmem>>, %arg2: memref<256x4xf32, #tpu.memory_space<vmem>>, %arg3: memref<4x8xbf16, #tpu.memory_space<vmem>>, %arg4: memref<1x8xf32, #tpu.memory_space<vmem>>, %arg5: memref<8x4xbf16, #tpu.memory_space<vmem>>, %arg6: memref<1x4xf32, #tpu.memory_space<vmem>>, %arg7: memref<256x4xf32, #tpu.memory_space<vmem>>) attributes {dimension_semantics = [#tpu.dimension_semantics<parallel>], iteration_bounds = array<i64: 2>, scalar_prefetch = 0 : i64, scratch_operands = 0 : i64, tpu.core_type = #tpu.core_type<tc>, window_params = [{transform_indices = @transform_0, window_bounds = array<i64: 256, 4>}, {transform_indices = @transform_1, window_bounds = array<i64: 256, 4>}, {pipeline_mode = #tpu.pipeline_mode<synchronous>, transform_indices = @transform_2, window_bounds = array<i64: 4, 8>}, {pipeline_mode = #tpu.pipeline_mode<synchronous>, transform_indices = @transform_3, window_bounds = array<i64: 1, 8>}, {pipeline_mode = #tpu.pipeline_mode<synchronous>, transform_indices = @transform_4, window_bounds = array<i64: 8, 4>}, {pipeline_mode = #tpu.pipeline_mode<synchronous>, transform_indices = @transform_5, window_bounds = array<i64: 1, 4>}, {transform_indices = @transform_6, window_bounds = array<i64: 256, 4>}]} {
    %c0 = arith.constant 0 : index
    %c0_0 = arith.constant 0 : index
    %0 = vector.load %arg1[%c0, %c0_0] : memref<256x4xf32, #tpu.memory_space<vmem>>, vector<256x4xf32>
    %c0_1 = arith.constant 0 : index
    %c0_2 = arith.constant 0 : index
    %1 = vector.load %arg2[%c0_1, %c0_2] : memref<256x4xf32, #tpu.memory_space<vmem>>, vector<256x4xf32>
    %2 = arith.addf %0, %1 : vector<256x4xf32>
    %3 = arith.truncf %2 : vector<256x4xf32> to vector<256x4xbf16>
    %c0_3 = arith.constant 0 : index
    %c0_4 = arith.constant 0 : index
    %4 = vector.load %arg3[%c0_3, %c0_4] : memref<4x8xbf16, #tpu.memory_space<vmem>>, vector<4x8xbf16>
    %cst = arith.constant dense<0.000000e+00> : vector<256x8xf32>
    %5 = tpu.matmul %3, %4, %cst {dimension_numbers = #tpu.dot_dimension_numbers<[1], [0], [0], [1], [0, 0, 1, 1], [], []>} : vector<256x4xbf16>, vector<4x8xbf16>, vector<256x8xf32> -> vector<256x8xf32>
    %c0_5 = arith.constant 0 : index
    %c0_6 = arith.constant 0 : index
    %6 = vector.load %arg4[%c0_5, %c0_6] : memref<1x8xf32, #tpu.memory_space<vmem>>, vector<1x8xf32>
    %7 = vector.broadcast %6 : vector<1x8xf32> to vector<256x8xf32>
    %8 = arith.addf %5, %7 : vector<256x8xf32>
    %cst_7 = arith.constant 0.000000e+00 : f32
    %9 = vector.broadcast %cst_7 : f32 to vector<256x8xf32>
    %10 = arith.maximumf %8, %9 : vector<256x8xf32>
    %11 = arith.truncf %10 : vector<256x8xf32> to vector<256x8xbf16>
    %c0_8 = arith.constant 0 : index
    %c0_9 = arith.constant 0 : index
    %12 = vector.load %arg5[%c0_8, %c0_9] : memref<8x4xbf16, #tpu.memory_space<vmem>>, vector<8x4xbf16>
    %cst_10 = arith.constant dense<0.000000e+00> : vector<256x4xf32>
    %13 = tpu.matmul %11, %12, %cst_10 {dimension_numbers = #tpu.dot_dimension_numbers<[1], [0], [0], [1], [0, 0, 1, 1], [], []>} : vector<256x8xbf16>, vector<8x4xbf16>, vector<256x4xf32> -> vector<256x4xf32>
    %c0_11 = arith.constant 0 : index
    %c0_12 = arith.constant 0 : index
    %14 = vector.load %arg6[%c0_11, %c0_12] : memref<1x4xf32, #tpu.memory_space<vmem>>, vector<1x4xf32>
    %15 = vector.broadcast %14 : vector<1x4xf32> to vector<256x4xf32>
    %16 = arith.addf %13, %15 : vector<256x4xf32>
    %c0_13 = arith.constant 0 : index
    %c0_14 = arith.constant 0 : index
    %17 = vector.load %arg7[%c0_13, %c0_14] : memref<256x4xf32, #tpu.memory_space<vmem>>, vector<256x4xf32>
    tpu.vector_store %arg7[%c0_13, %c0_14], %16 {strides = array<i32>} : memref<256x4xf32, #tpu.memory_space<vmem>>, vector<256x4xf32>,
    return
  }
  func.func @transform_0(%arg0: i32) -> (i32, i32) {
    %c0_i32 = arith.constant 0 : i32
    %c0_i32_0 = arith.constant 0 : i32
    return %arg0, %c0_i32 : i32, i32
  }
  func.func @transform_1(%arg0: i32) -> (i32, i32) {
    %c0_i32 = arith.constant 0 : i32
    %c0_i32_0 = arith.constant 0 : i32
    return %arg0, %c0_i32 : i32, i32
  }
  func.func @transform_2(%arg0: i32) -> (i32, i32) {
    %c0_i32 = arith.constant 0 : i32
    %c0_i32_0 = arith.constant 0 : i32
    %c0_i32_1 = arith.constant 0 : i32
    return %c0_i32, %c0_i32_0 : i32, i32
  }
  func.func @transform_3(%arg0: i32) -> (i32, i32) {
    %c0_i32 = arith.constant 0 : i32
    %c0_i32_0 = arith.constant 0 : i32
    %c0_i32_1 = arith.constant 0 : i32
    return %c0_i32, %c0_i32_0 : i32, i32
  }
  func.func @transform_4(%arg0: i32) -> (i32, i32) {
    %c0_i32 = arith.constant 0 : i32
    %c0_i32_0 = arith.constant 0 : i32
    %c0_i32_1 = arith.constant 0 : i32
    return %c0_i32, %c0_i32_0 : i32, i32
  }
  func.func @transform_5(%arg0: i32) -> (i32, i32) {
    %c0_i32 = arith.constant 0 : i32
    %c0_i32_0 = arith.constant 0 : i32
    %c0_i32_1 = arith.constant 0 : i32
    return %c0_i32, %c0_i32_0 : i32, i32
  }
  func.func @transform_6(%arg0: i32) -> (i32, i32) {
    %c0_i32 = arith.constant 0 : i32
    %c0_i32_0 = arith.constant 0 : i32
    return %arg0, %c0_i32 : i32, i32
  }
}

</mosaic_0001>

<bundles_post_ra>
// kernel: reverse.5
= control target key start
LH: loop header
LB: loop body
LE: loop exit
PB: predicated region body
PF: predicated region fallthrough
CT: control target
= control target key end

     0   :  { %v2_v0 = vlaneseq  ;;  %s415_s0 = inlined_call_operand.vmem [shape: f32[2,4,16,7], index: 0, kind: input, shape index: {}]   ;;  %s416_s1 = inlined_call_operand.vmem [shape: f32[2,4,16,7], index: 1, kind: output, shape index: {}]  }
   0x1   :  { %v71_v2 = vld [vmem:[%s415_s0 + $0x20] sm:$0xff]  ;;  %v67_v3 = vld [vmem:[%s415_s0 + $0x10] sm:$0xff]  ;;  %v73_v5 = vld [vmem:[%s415_s0 + $0x28] sm:$0xff] }
   0x2   :  { %v3_v1 = vsub.s32 6, %v2_v0  ;;  %v63_v4 = vld [vmem:[%s415_s0] sm:$0xff]  ;;  %v69_v6 = vld [vmem:[%s415_s0 + $0x18] sm:$0xff]  ;;  %v65_v7 = vld [vmem:[%s415_s0 + $0x8] sm:$0xff] }
   0x3   :  { %v79_v8 = vld [vmem:[%s415_s0 + $0x40] sm:$0xff]  ;;  %v77_v9 = vld [vmem:[%s415_s0 + $0x38] sm:$0xff]  ;;  %v75_v10 = vld [vmem:[%s415_s0 + $0x30] sm:$0xff] }
   0x4   :  { %4 = vset.pattern.permute.xlu0 %v3_v1  ;;  %308 = vset.pattern.permute.xlu2 %v3_v1  ;;  %v85_v11 = vld [vmem:[%s415_s0 + $0x58] sm:$0xff]  ;;  %v83_v12 = vld [vmem:[%s415_s0 + $0x50] sm:$0xff]  ;;  %v81_v13 = vld [vmem:[%s415_s0 + $0x48] sm:$0xff] }
   0x5   :  { %307 = vset.pattern.permute.xlu1 %v3_v1  ;;  %123 = vperm.xlu2 %308, %v71_v2   ;;  %v91_v14 = vld [vmem:[%s415_s0 + $0x70] sm:$0xff]  ;;  %v89_v15 = vld [vmem:[%s415_s0 + $0x68] sm:$0xff]  ;;  %v87_v16 = vld [vmem:[%s415_s0 + $0x60] sm:$0xff] }
   0x6   :  { %111 = vperm.xlu1 %307, %v67_v3   ;;  %99 = vperm.xlu0 %4, %v63_v4   ;;  %v93_v17 = vld [vmem:[%s415_s0 + $0x78] sm:$0xff] }
   0xd   :  { %129 = vperm.xlu2 %308, %v73_v5  }
   0xe   :  { %117 = vperm.xlu1 %307, %v69_v6   ;;  %105 = vperm.xlu0 %4, %v65_v7  }
  0x15   :  { %147 = vperm.xlu2 %308, %v79_v8  }
  0x16   :  { %141 = vperm.xlu1 %307, %v77_v9   ;;  %135 = vperm.xlu0 %4, %v75_v10  }
  0x1d   :  { %165 = vperm.xlu2 %308, %v85_v11  }
  0x1e   :  { %159 = vperm.xlu1 %307, %v83_v12   ;;  %153 = vperm.xlu0 %4, %v81_v13  }
  0x25   :  { %183 = vperm.xlu2 %308, %v91_v14  }
  0x26   :  { %177 = vperm.xlu1 %307, %v89_v15   ;;  %171 = vperm.xlu0 %4, %v87_v16  }
  0x2e   :  { %189 = vperm.xlu0 %4, %v93_v17  }
  0x5f   :  { %v124_v18 = vpop.permute.xlu2 %123 }
  0x60   :  { %259 = vst [vmem:[%s416_s1 + $0x20] sm:$0xff] %v124_v18 }
  0x67   :  { %v130_v19 = vpop.permute.xlu2 %129 }
  0x68   :  { %261 = vst [vmem:[%s416_s1 + $0x28] sm:$0xff] %v130_v19 }
  0x6f   :  { %v148_v20 = vpop.permute.xlu2 %147 }
  0x70   :  { %267 = vst [vmem:[%s416_s1 + $0x40] sm:$0xff] %v148_v20 }
  0x77   :  { %v166_v21 = vpop.permute.xlu2 %165 }
  0x78   :  { %v112_v22 = vpop.permute.xlu1 %111  ;;  %273 = vst [vmem:[%s416_s1 + $0x58] sm:$0xff] %v166_v21  ;;  %v100_v23 = vpop.permute.xlu0 %99 }
  0x79   :  { %255 = vst [vmem:[%s416_s1 + $0x10] sm:$0xff] %v112_v22 }
  0x7a   :  { %251 = vst [vmem:[%s416_s1] sm:$0xff] %v100_v23 }
  0x7f   :  { %v184_v24 = vpop.permute.xlu2 %183 }
  0x80   :  { %v118_v25 = vpop.permute.xlu1 %117  ;;  %279 = vst [vmem:[%s416_s1 + $0x70] sm:$0xff] %v184_v24  ;;  %v106_v26 = vpop.permute.xlu0 %105 }
  0x81   :  { %257 = vst [vmem:[%s416_s1 + $0x18] sm:$0xff] %v118_v25 }
  0x82   :  { %253 = vst [vmem:[%s416_s1 + $0x8] sm:$0xff] %v106_v26 }
  0x88   :  { %v142_v27 = vpop.permute.xlu1 %141  ;;  %v136_v28 = vpop.permute.xlu0 %135 }
  0x89   :  { %265 = vst [vmem:[%s416_s1 + $0x38] sm:$0xff] %v142_v27 }
  0x8a   :  { %263 = vst [vmem:[%s416_s1 + $0x30] sm:$0xff] %v136_v28 }
  0x90   :  { %v160_v29 = vpop.permute.xlu1 %159  ;;  %v154_v30 = vpop.permute.xlu0 %153 }
  0x91   :  { %271 = vst [vmem:[%s416_s1 + $0x50] sm:$0xff] %v160_v29 }
  0x92   :  { %269 = vst [vmem:[%s416_s1 + $0x48] sm:$0xff] %v154_v30 }
  0x98   :  { %v178_v31 = vpop.permute.xlu1 %177  ;;  %v172_v32 = vpop.permute.xlu0 %171 }
  0x99   :  { %277 = vst [vmem:[%s416_s1 + $0x68] sm:$0xff] %v178_v31 }
  0x9a   :  { %275 = vst [vmem:[%s416_s1 + $0x60] sm:$0xff] %v172_v32 }
  0xa0   :  { %v190_v33 = vpop.permute.xlu0 %189 }
  0xa1   :  { %281 = vst [vmem:[%s416_s1 + $0x78] sm:$0xff] %v190_v33 }

// kernel: spectral_conv2d_forward.4
= control target key start
LH: loop header
LB: loop body
LE: loop exit
PB: predicated region body
PF: predicated region fallthrough
CT: control target
= control target key end

     0   :  { %s616_s9 = smov 0   ;;  %s618_s10 = smov 0   ;;  %s716_s0 = inlined_call_operand.vmem [shape: bf16[4,32,8], index: 0, kind: input, shape index: {}]   ;;  %s717_s1 = inlined_call_operand.vmem [shape: bf16[4,8,8], index: 1, kind: input, shape index: {}]   ;;  %s718_s2 = inlined_call_operand.vmem [shape: f32[4,32,8], index: 2, kind: output, shape index: {}]  }
   0x1   :  { %s620_s11 = smov 0   ;;  %s622_s12 = smov 0  }
   0x2   :  { %s624_s13 = smov 0   ;;  %s626_s14 = smov 0  }
   0x3   :  { %s628_s15 = smov 0  }
   0x4 LB: > { %s21_s16 = sadd.s32 1, %s591_s13  ;;  %s24_s17 = sadd.s32 1, %s595_s14  ;;  %s599_s15 = sphi %s628_s15, %s12_s15   ;;  %s595_s14 = sphi %s626_s14, %s725_s14   ;;  %s591_s13 = sphi %s624_s13, %s724_s13   ;;  %s587_s12 = sphi %s622_s12, %s723_s12   ;;  %s583_s11 = sphi %s620_s11, %s722_s11   ;;  %s579_s10 = sphi %s618_s10, %s721_s10   ;;  %s575_s9 = sphi %s616_s9, %s720_s9  }
   0x5   : > { %p22_p0 = scmp.ge.s32.totalorder %s21_s16, 2  ;;  %s449_s18 = sadd.s32 4294967295, %s599_s15  }
   0x6   : > { %p40_p1 = scmp.ne.s32.totalorder %s579_s10, %s575_s9  ;;  %p41_p2 = scmp.eq.s32.totalorder %s599_s15, 0 }
   0x7   : > { %s727_s16 = smov (%p22_p0, %s21_s16), 0  ;;  %s729_s17 = smov (!%p22_p0, %s24_s17), %s595_s14 }
   0x8   : > { %p26_p3 = scmp.ge.s32.totalorder %s729_s17, 2  ;;  %p98_p4 = scmp.eq.s32.totalorder %s449_s18, 3 }
   0x9   : > { %s29_s19 = ssub.s32 %s591_s13, %s727_s16  ;;  %p42_p5 = por %p41_p2, %p40_p1 }
   0xa   : > { %s731_s17 = smov (%p26_p3, %s729_s17), 0  ;;  %p664_p6 = por %p98_p4, %p40_p1 }
   0xb   : > { %s28_s21 = ssub.s32 %s595_s14, %s731_s17  ;;  %s33_s23 = sadd.s32 1, %s579_s10 }
   0xc   : > { %s30_s22 = sor.u32 %s29_s19, %s28_s21  ;;  %p452_p8 = scmp.ge.s32.totalorder %s599_s15, 4 }
   0xd   : > { %p31_p7 = scmp.eq.s32.totalorder %s30_s22, 0 }
   0xe   : > { %120 = sbr.rel (%p452_p8) target bundleno = 28 (0x1c), region = 16 }
   0xf   : > { %s672_s24 = scalar_select %p31_p7, %s579_s10, %s33_s23  }
  0x13   : > { %123 = sbr.rel (!%p42_p5) target bundleno = 28 (0x1c), region = 20  ;;  %s125_s25 = sand.u32 (%p42_p5), 1, %s579_s10  }
  0x14   : > { %s455_s26 = sshll.u32 (%p42_p5), %s591_s13, 1  ;;  %s453_s27 = sshll.u32 (%p42_p5), %s125_s25, 4 }
  0x15   : > { %s485_s28 = sshll.u32 (%p42_p5), %s595_s14, 3  ;;  %s127_s6 = scalar_lea.vmem (%p42_p5), [#allocation2], %s453_s27 }
  0x16   : > { %s131_s29 = sadd.s32 (%p42_p5), %s485_s28, %s455_s26 }
  0x17   : > { %s457_s30 = sshll.u32 (%p42_p5), %s131_s29, 2 }
  0x18   : > { %s133_s5 = scalar_lea.vmem %s716_s0, %s457_s30 }
  0x19   : > { %v150_v0 = vld [vmem:[%s133_s5] sm:$0xff]   ;;  %v154_v1 = vld [vmem:[%s133_s5 + $0x10] sm:$0xff]  }
  0x1a   : > { %151 = vst [vmem:[%s127_s6] sm:$0xff] %v150_v0  }
  0x1b   : > { %155 = vst [vmem:[%s127_s6 + $0x8] sm:$0xff] %v154_v1  }
  0x1c PF: > { %p458_p9 = scmp.ge.s32.totalorder %s599_s15, 1  ;;  %p197_p10 = scmp.lt.s32.totalorder %s599_s15, 5 }
  0x1e   : > { %p198_p11 = pnand %p458_p9, %p197_p10 }
  0x1f   : > { %s461_s7 = sshll.u32 (!%p198_p11), %s587_s12, 1  ;;  %s204_s8 = sand.u32 (!%p198_p11), 1, %s575_s9  }
  0x20   : > { %201 = sbr.rel (%p198_p11) target bundleno = 189 (0xbd), region = 65  ;;  %p232_p12 = scmp.lt.s32.totalorder (!%p198_p11), %s461_s7, 3 }
  0x21   : > { %s459_s18 = sshll.u32 (!%p198_p11), %s204_s8, 4  ;;  %s460_s9 = sshll.u32 (!%p198_p11), %s204_s8, 5 }
  0x22   : > { %s206_s25 = scalar_lea.vmem (!%p198_p11), [#allocation2], %s459_s18  ;;  %s228_s26 = scalar_lea.vmem (!%p198_p11), [#allocation3], %s460_s9 }
  0x25   : > { %s733_s7 = smov (!%p232_p12, %s461_s7), 3  ;;  %vm252_vm0 = vcmask 1043456   ;;  %v486_v6 = vld [vmem:[%s206_s25] sm:$0xff]  ;;  %v487_v7 = vld [vmem:[%s206_s25 + $0x8] sm:$0xff]  ;;  %vm248_vm1 = vcmask 64512   ;;  %s480_s27 = sshll.u32 (%p664_p6), %s583_s11, 1 }
  0x26   : > { %s462_s19 = sshll.u32 %s733_s7, 2  ;;  %s488_s28 = sshll.u32 (%p664_p6), %s587_s12, 3 }
  0x27   : > { %s235_s23 = scalar_lea.vmem %s717_s1, %s462_s19  ;;  %s315_s29 = sadd.s32 (%p664_p6), %s488_s28, %s480_s27 }
  0x28   : > { %v242_v2 = vld [vmem:[%s235_s23] sm:$0xf]  ;;  %v470_v3 = vld [vmem:[%s235_s23 + $0x4] sm:$0xf]  ;;  %s482_s30 = sshll.u32 (%p664_p6), %s315_s29, 3 }
  0x29   : > { %v254_v4 = vsel %vm252_vm0, %v242_v2, 0  ;;  %v286_v5 = vsel %vm252_vm0, %v470_v3, 0  ;;  %s317_s5 = scalar_lea.vmem (%p664_p6), %s718_s2, %s482_s30 }
  0x2a   : > { %263 = vmatpush.bf16.msra.mxu0 %v254_v4  ;;  %295 = vmatpush.bf16.msra.mxu1 %v286_v5 }
  0x2d   : > { %467 = vmatmul.msk.bf16.vlgmr.msra.gmra.mxu0 %vm248_vm1, %v486_v6  ;;  %475 = vmatmul.msk.bf16.vlgmr.msra.gmra.mxu1 %vm248_vm1, %v487_v7 }
  0xaa   : > { %v265_v8 = vpop.f32.mrf.mxu0  ;;  %v297_v9 = vpop.f32.mrf.mxu1 }
  0xab   : > { %270 = vst.msk [vmem:[%s228_s26] sm:$0xff] %vm248_vm1, %v265_v8 }
  0xac   : > { %476 = vst.msk [vmem:[%s228_s26 + $0x10] sm:$0xff] %vm248_vm1, %v297_v9 }
  0xb0   : > { %311 = sbr.rel (!%p664_p6) target bundleno = 189 (0xbd), region = 73 }
  0xb2   : > { %v267_v10 = vpop.f32.mrf.mxu0  ;;  %v299_v11 = vpop.f32.mrf.mxu1  ;;  %v352_v12 = vld [vmem:[%s228_s26] sm:$0xff] (%p664_p6) }
  0xb3   : > { %271 = vst.msk [vmem:[%s228_s26 + $0x8] sm:$0xff] %vm248_vm1, %v267_v10  ;;  %v356_v14 = vld [vmem:[%s228_s26 + $0x10] sm:$0xff] (%p664_p6) }
  0xb4   : > { %477 = vst.msk [vmem:[%s228_s26 + $0x18] sm:$0xff] %vm248_vm1, %v299_v11 }
  0xb5   : > { %353 = vst [vmem:[%s317_s5] sm:$0xff] %v352_v12 }
  0xb6   : > { %357 = vst [vmem:[%s317_s5 + $0x20] sm:$0xff] %v356_v14 }
  0xba   : > { %v354_v13 = vld [vmem:[%s228_s26 + $0x8] sm:$0xff] }
  0xbb   : > { %v358_v15 = vld [vmem:[%s228_s26 + $0x18] sm:$0xff]  ;;  %355 = vst [vmem:[%s317_s5 + $0x8] sm:$0xff] %v354_v13 }
  0xbc   : > { %359 = vst [vmem:[%s317_s5 + $0x28] sm:$0xff] %v358_v15 }
  0xbd PF: > { %s12_s15 = sadd.s32 1, %s599_s15   ;;  %s720_s9 = smov %s579_s10 }
  0xbe   : > { %p9_p13 = scmp.ge.s32.totalorder %s12_s15, 6   ;;  %s721_s10 = smov %s672_s24 }
  0xbf   : > { %s722_s11 = smov %s591_s13  ;;  %s723_s12 = smov %s595_s14 }
  0xc0   : > { %s724_s13 = smov %s727_s16  ;;  %s725_s14 = smov %s731_s17 }
  0xc1   :  { %11 = sbr.rel (!%p9_p13) target bundleno = 4 (0x4), region = 148 }

// kernel: spectral_conv2d_forward.5
= control target key start
LH: loop header
LB: loop body
LE: loop exit
PB: predicated region body
PF: predicated region fallthrough
CT: control target
= control target key end

     0   :  { %s932_s21 = smov 0   ;;  %s1203_s0 = inlined_call_operand.vmem [shape: f32[512,4], index: 0, kind: input, shape index: {}]   ;;  %s1204_s1 = inlined_call_operand.vmem [shape: f32[512,4], index: 1, kind: input, shape index: {}]   ;;  %s1205_s2 = inlined_call_operand.vmem [shape: bf16[4,8], index: 2, kind: input, shape index: {}]   ;;  %s1206_s3 = inlined_call_operand.vmem [shape: f32[1,8], index: 3, kind: input, shape index: {}]   ;;  %s1207_s4 = inlined_call_operand.vmem [shape: bf16[8,4], index: 4, kind: input, shape index: {}]   ;;  %s1208_s5 = inlined_call_operand.vmem [shape: f32[1,4], index: 5, kind: input, shape index: {}]   ;;  %s1209_s6 = inlined_call_operand.vmem [shape: f32[512,4], index: 6, kind: output, shape index: {}]  }
   0x1 LB: > { %s832_s22 = sadd.s32 4294967295, %s895_s21   ;;  %p836_p0 = scmp.ge.s32.totalorder %s895_s21, 1  ;;  %s895_s21 = sphi %s932_s21, %s16_s21  }
   0x2   : > { %p224_p1 = scmp.lt.s32.totalorder %s895_s21, 3 }
   0x4   : > { %p225_p2 = pnand %p836_p0, %p224_p1 }
   0x5   : > { %s837_s25 = sshll.u32 (!%p225_p2), %s832_s22, 5 }
   0x6   : > { %228 = sbr.rel (%p225_p2) target bundleno = 423 (0x1a7), region = 44  ;;  %p260_p3 = scmp.lt.s32.totalorder (!%p225_p2), %s837_s25, 63 }
   0xb   : > { %v390_v0 = vld [vmem:[%s1205_s2] sm:$0x3]  ;;  %vm444_vm0 = vcmask 1041408   ;;  %s1211_s25 = smov (!%p260_p3, %s837_s25), 63  ;;  %vm395_vm1 = vcmask 31744   ;;  %vm639_vm2 = vcmask 1043456  }
   0xc   : > { %v446_v1 = vsel %vm444_vm0, %v390_v0, 0  ;;  %s943_s26 = sshll.u32 %s1211_s25, 3  ;;  %vm590_vm3 = vcmask 64512  }
   0xd   : > { %455 = vmatpush.bf16.msra.mxu0 %v446_v1  ;;  %877 = vmatpush.bf16.msra.mxu2 %v446_v1  ;;  %s949_s29 = scalar_lea.vmem %s1203_s0, %s943_s26  ;;  %s955_s8 = scalar_lea.vmem %s1204_s1, %s943_s26 }
   0xe   : > { %v278_v2 = vld [vmem:[%s949_s29] sm:$0xff]  ;;  %v279_v3 = vld [vmem:[%s949_s29 + $0x8] sm:$0xff]  ;;  %v280_v16 = vld [vmem:[%s949_s29 + $0x10] sm:$0xff]  ;;  %s1102_s17 = scalar_lea.vmem %s1209_s6, %s943_s26 }
   0xf   : > { %v310_v4 = vld [vmem:[%s955_s8] sm:$0xff]  ;;  %v311_v5 = vld [vmem:[%s955_s8 + $0x8] sm:$0xff]  ;;  %v281_v17 = vld [vmem:[%s949_s29 + $0x18] sm:$0xff] }
  0x10   : > { %v342_v6 = vadd.f32 %v310_v4, %v278_v2  ;;  %v294_v7 = vld [vmem:[%s949_s29 + $0x80] sm:$0xff]  ;;  %v295_v8 = vld [vmem:[%s949_s29 + $0x88] sm:$0xff]  ;;  %v343_v9 = vadd.f32 %v311_v5, %v279_v3  ;;  %v312_v18 = vld [vmem:[%s955_s8 + $0x10] sm:$0xff] }
  0x11   : > { %v326_v10 = vld [vmem:[%s955_s8 + $0x80] sm:$0xff]  ;;  %v327_v11 = vld [vmem:[%s955_s8 + $0x88] sm:$0xff]  ;;  %v313_v19 = vld [vmem:[%s955_s8 + $0x18] sm:$0xff]  ;;  %v344_v24 = vadd.f32 %v312_v18, %v280_v16 }
  0x12   : > { %v358_v12 = vadd.f32 %v326_v10, %v294_v7  ;;  %v359_v13 = vadd.f32 %v327_v11, %v295_v8  ;;  %v374_v14 = vpack.c.bf16 %v343_v9, %v342_v6  ;;  %v296_v20 = vld [vmem:[%s949_s29 + $0x90] sm:$0xff]  ;;  %v297_v21 = vld [vmem:[%s949_s29 + $0x98] sm:$0xff]  ;;  %v345_v25 = vadd.f32 %v313_v19, %v281_v17  ;;  %v282_v30 = vld [vmem:[%s949_s29 + $0x20] sm:$0xff] }
  0x13   : > { %v328_v22 = vld [vmem:[%s955_s8 + $0x90] sm:$0xff]  ;;  %v329_v23 = vld [vmem:[%s955_s8 + $0x98] sm:$0xff]  ;;  %v283_v31 = vld [vmem:[%s949_s29 + $0x28] sm:$0xff] }
  0x14   : > { %v382_v15 = vpack.c.bf16 %v359_v13, %v358_v12  ;;  %843 = vmatmul.msk.bf16.vlgmr.msra.gmra.mxu0 %vm395_vm1, %v374_v14  ;;  %v360_v26 = vadd.f32 %v328_v22, %v296_v20  ;;  %v361_v27 = vadd.f32 %v329_v23, %v297_v21  ;;  %v375_v28 = vpack.c.bf16 %v345_v25, %v344_v24  ;;  %v314_v32 = vld [vmem:[%s955_s8 + $0x20] sm:$0xff]  ;;  %v315_v33 = vld [vmem:[%s955_s8 + $0x28] sm:$0xff]  ;;  %v284_v44 = vld [vmem:[%s949_s29 + $0x30] sm:$0xff] }
  0x15   : > { %v298_v34 = vld [vmem:[%s949_s29 + $0xa0] sm:$0xff]  ;;  %v299_v35 = vld [vmem:[%s949_s29 + $0xa8] sm:$0xff]  ;;  %v346_v38 = vadd.f32 %v314_v32, %v282_v30  ;;  %v347_v39 = vadd.f32 %v315_v33, %v283_v31  ;;  %v285_v45 = vld [vmem:[%s949_s29 + $0x38] sm:$0xff] }
  0x16   : > { %851 = vmatmul.msk.bf16.vlgmr.msra.gmra.mxu2 %vm395_vm1, %v382_v15  ;;  %v383_v29 = vpack.c.bf16 %v361_v27, %v360_v26  ;;  %v330_v36 = vld [vmem:[%s955_s8 + $0xa0] sm:$0xff]  ;;  %v331_v37 = vld [vmem:[%s955_s8 + $0xa8] sm:$0xff]  ;;  %v316_v46 = vld [vmem:[%s955_s8 + $0x30] sm:$0xff] }
  0x17   : > { %v362_v40 = vadd.f32 %v330_v36, %v298_v34  ;;  %v363_v41 = vadd.f32 %v331_v37, %v299_v35  ;;  %v376_v42 = vpack.c.bf16 %v347_v39, %v346_v38  ;;  %v317_v47 = vld [vmem:[%s955_s8 + $0x38] sm:$0xff]  ;;  %v300_v48 = vld [vmem:[%s949_s29 + $0xb0] sm:$0xff]  ;;  %v348_v52 = vadd.f32 %v316_v46, %v284_v44  ;;  %v286_v58 = vld [vmem:[%s949_s29 + $0x40] sm:$0xff] }
  0x18   : > { %v301_v49 = vld [vmem:[%s949_s29 + $0xb8] sm:$0xff]  ;;  %v332_v50 = vld [vmem:[%s955_s8 + $0xb0] sm:$0xff]  ;;  %v349_v53 = vadd.f32 %v317_v47, %v285_v45  ;;  %v287_v59 = vld [vmem:[%s949_s29 + $0x48] sm:$0xff] }
  0x19   : > { %v384_v43 = vpack.c.bf16 %v363_v41, %v362_v40  ;;  %v333_v51 = vld [vmem:[%s955_s8 + $0xb8] sm:$0xff]  ;;  %v364_v54 = vadd.f32 %v332_v50, %v300_v48  ;;  %v318_v60 = vld [vmem:[%s955_s8 + $0x40] sm:$0xff]  ;;  %v319_v61 = vld [vmem:[%s955_s8 + $0x48] sm:$0xff] }
  0x1a   : > { %v365_v55 = vadd.f32 %v333_v51, %v301_v49  ;;  %v377_v56 = vpack.c.bf16 %v349_v53, %v348_v52  ;;  %v302_v62 = vld [vmem:[%s949_s29 + $0xc0] sm:$0xff]  ;;  %v303_v63 = vld [vmem:[%s949_s29 + $0xc8] sm:$0xff]  ;;  %v350_v2 = vadd.f32 %v318_v60, %v286_v58  ;;  %v351_v3 = vadd.f32 %v319_v61, %v287_v59  ;;  %v288_v8 = vld [vmem:[%s949_s29 + $0x50] sm:$0xff] }
  0x1b   : > { %v334_v0 = vld [vmem:[%s955_s8 + $0xc0] sm:$0xff]  ;;  %v335_v1 = vld [vmem:[%s955_s8 + $0xc8] sm:$0xff]  ;;  %v289_v9 = vld [vmem:[%s949_s29 + $0x58] sm:$0xff] }
  0x1c   : > { %v385_v57 = vpack.c.bf16 %v365_v55, %v364_v54  ;;  %v366_v4 = vadd.f32 %v334_v0, %v302_v62  ;;  %v367_v5 = vadd.f32 %v335_v1, %v303_v63  ;;  %v378_v6 = vpack.c.bf16 %v351_v3, %v350_v2  ;;  %v320_v10 = vld [vmem:[%s955_s8 + $0x50] sm:$0xff]  ;;  %v321_v11 = vld [vmem:[%s955_s8 + $0x58] sm:$0xff]  ;;  %v290_v22 = vld [vmem:[%s949_s29 + $0x60] sm:$0xff] }
  0x1d   : > { %v304_v12 = vld [vmem:[%s949_s29 + $0xd0] sm:$0xff]  ;;  %v305_v13 = vld [vmem:[%s949_s29 + $0xd8] sm:$0xff]  ;;  %v352_v16 = vadd.f32 %v320_v10, %v288_v8  ;;  %v353_v17 = vadd.f32 %v321_v11, %v289_v9  ;;  %v291_v23 = vld [vmem:[%s949_s29 + $0x68] sm:$0xff] }
  0x1e   : > { %v386_v7 = vpack.c.bf16 %v367_v5, %v366_v4  ;;  %v336_v14 = vld [vmem:[%s955_s8 + $0xd0] sm:$0xff]  ;;  %v337_v15 = vld [vmem:[%s955_s8 + $0xd8] sm:$0xff]  ;;  %v322_v24 = vld [vmem:[%s955_s8 + $0x60] sm:$0xff] }
  0x1f   : > { %v368_v18 = vadd.f32 %v336_v14, %v304_v12  ;;  %v369_v19 = vadd.f32 %v337_v15, %v305_v13  ;;  %v379_v20 = vpack.c.bf16 %v353_v17, %v352_v16  ;;  %v323_v25 = vld [vmem:[%s955_s8 + $0x68] sm:$0xff]  ;;  %v306_v26 = vld [vmem:[%s949_s29 + $0xe0] sm:$0xff]  ;;  %v354_v30 = vadd.f32 %v322_v24, %v290_v22  ;;  %v292_v36 = vld [vmem:[%s949_s29 + $0x70] sm:$0xff] }
  0x20   : > { %v307_v27 = vld [vmem:[%s949_s29 + $0xe8] sm:$0xff]  ;;  %v355_v31 = vadd.f32 %v323_v25, %v291_v23  ;;  %v293_v37 = vld [vmem:[%s949_s29 + $0x78] sm:$0xff]  ;;  %v324_v38 = vld [vmem:[%s955_s8 + $0x70] sm:$0xff] }
  0x21   : > { %v387_v21 = vpack.c.bf16 %v369_v19, %v368_v18  ;;  %v325_v39 = vld [vmem:[%s955_s8 + $0x78] sm:$0xff]  ;;  %v308_v40 = vld [vmem:[%s949_s29 + $0xf0] sm:$0xff]  ;;  %v356_v44 = vadd.f32 %v324_v38, %v292_v36  ;;  %v585_v46 = vld [vmem:[%s1207_s4] sm:$0xf] }
  0x22   : > { %v380_v34 = vpack.c.bf16 %v355_v31, %v354_v30  ;;  %v309_v41 = vld [vmem:[%s949_s29 + $0xf8] sm:$0xff]  ;;  %v357_v45 = vadd.f32 %v325_v39, %v293_v37  ;;  %v641_v49 = vsel %vm639_vm2, %v585_v46, 0  ;;  %v1043_v53 = vld [vmem:[%s1206_s3] ss:$0 sm:$0xff] }
  0x23   : > { %650 = vmatpush.bf16.msra.mxu1 %v641_v49  ;;  %878 = vmatpush.bf16.msra.mxu3 %v641_v49 }
  0x24   : > { %844 = vmatmul.msk.bf16.gmra.mxu0 %vm395_vm1, %v375_v28  ;;  %v338_v28 = vld [vmem:[%s955_s8 + $0xe0] sm:$0xff]  ;;  %v381_v50 = vpack.c.bf16 %v357_v45, %v356_v44 }
  0x25   : > { %v370_v32 = vadd.f32 %v338_v28, %v306_v26 }
  0x26   : > { %852 = vmatmul.msk.bf16.gmra.mxu2 %vm395_vm1, %v383_v29  ;;  %v339_v29 = vld [vmem:[%s955_s8 + $0xe8] sm:$0xff] }
  0x27   : > { %v371_v33 = vadd.f32 %v339_v29, %v307_v27 }
  0x29   : > { %v388_v35 = vpack.c.bf16 %v371_v33, %v370_v32 }
  0x34   : > { %845 = vmatmul.msk.bf16.gmra.mxu0 %vm395_vm1, %v376_v42  ;;  %v340_v42 = vld [vmem:[%s955_s8 + $0xf0] sm:$0xff] }
  0x35   : > { %v372_v47 = vadd.f32 %v340_v42, %v308_v40 }
  0x36   : > { %853 = vmatmul.msk.bf16.gmra.mxu2 %vm395_vm1, %v384_v43  ;;  %v341_v43 = vld [vmem:[%s955_s8 + $0xf8] sm:$0xff] }
  0x37   : > { %v373_v48 = vadd.f32 %v341_v43, %v309_v41 }
  0x39   : > { %v389_v51 = vpack.c.bf16 %v373_v48, %v372_v47 }
  0x44   : > { %846 = vmatmul.msk.bf16.gmra.mxu0 %vm395_vm1, %v377_v56 }
  0x46   : > { %854 = vmatmul.msk.bf16.gmra.mxu2 %vm395_vm1, %v385_v57 }
  0x54   : > { %847 = vmatmul.msk.bf16.gmra.mxu0 %vm395_vm1, %v378_v6 }
  0x56   : > { %855 = vmatmul.msk.bf16.gmra.mxu2 %vm395_vm1, %v386_v7 }
  0x64   : > { %848 = vmatmul.msk.bf16.gmra.mxu0 %vm395_vm1, %v379_v20 }
  0x66   : > { %856 = vmatmul.msk.bf16.gmra.mxu2 %vm395_vm1, %v387_v21 }
  0x74   : > { %849 = vmatmul.msk.bf16.gmra.mxu0 %vm395_vm1, %v380_v34 }
  0x76   : > { %857 = vmatmul.msk.bf16.gmra.mxu2 %vm395_vm1, %v388_v35 }
  0x84   : > { %850 = vmatmul.msk.bf16.gmra.mxu0 %vm395_vm1, %v381_v50 }
  0x86   : > { %858 = vmatmul.msk.bf16.gmra.mxu2 %vm395_vm1, %v389_v51 }
  0x91   : > { %v457_v52 = vpop.f32.mrf.mxu0 }
  0x92   : > { %v458_v54 = vadd.f32 %v1043_v53, %v457_v52 }
  0x94   : > { %v537_v57 = vmax.f32 %v458_v54, 0.0 }
  0x99   : > { %v497_v55 = vpop.f32.mrf.mxu2  ;;  %v459_v56 = vpop.f32.mrf.mxu0 }
  0x9a   : > { %v460_v58 = vadd.f32 %v1043_v53, %v459_v56  ;;  %v498_v61 = vadd.f32 %v1043_v53, %v497_v55 }
  0x9c   : > { %v538_v59 = vmax.f32 %v460_v58, 0.0  ;;  %v553_v1 = vmax.f32 %v498_v61, 0.0 }
  0x9e   : > { %v569_v60 = vpack.c.bf16 %v538_v59, %v537_v57 }
  0xa0   : > { %859 = vmatmul.msk.bf16.vlgmr.msra.gmra.mxu1 %vm590_vm3, %v569_v60 }
  0xa1   : > { %v499_v62 = vpop.f32.mrf.mxu2  ;;  %v462_v0 = vpop.f32.mrf.mxu0 }
  0xa2   : > { %v500_v63 = vadd.f32 %v1043_v53, %v499_v62  ;;  %v463_v4 = vadd.f32 %v1043_v53, %v462_v0 }
  0xa4   : > { %v554_v2 = vmax.f32 %v500_v63, 0.0  ;;  %v539_v7 = vmax.f32 %v463_v4, 0.0 }
  0xa6   : > { %v577_v3 = vpack.c.bf16 %v554_v2, %v553_v1 }
  0xa8   : > { %867 = vmatmul.msk.bf16.vlgmr.msra.gmra.mxu3 %vm590_vm3, %v577_v3 }
  0xa9   : > { %v502_v5 = vpop.f32.mrf.mxu2  ;;  %v464_v6 = vpop.f32.mrf.mxu0 }
  0xaa   : > { %v465_v8 = vadd.f32 %v1043_v53, %v464_v6  ;;  %v503_v11 = vadd.f32 %v1043_v53, %v502_v5 }
  0xac   : > { %v540_v9 = vmax.f32 %v465_v8, 0.0  ;;  %v555_v15 = vmax.f32 %v503_v11, 0.0 }
  0xae   : > { %v570_v10 = vpack.c.bf16 %v540_v9, %v539_v7 }
  0xb0   : > { %860 = vmatmul.msk.bf16.gmra.mxu1 %vm590_vm3, %v570_v10 }
  0xb1   : > { %v504_v12 = vpop.f32.mrf.mxu2  ;;  %v467_v14 = vpop.f32.mrf.mxu0 }
  0xb2   : > { %v505_v13 = vadd.f32 %v1043_v53, %v504_v12  ;;  %v468_v18 = vadd.f32 %v1043_v53, %v467_v14 }
  0xb4   : > { %v556_v16 = vmax.f32 %v505_v13, 0.0  ;;  %v541_v21 = vmax.f32 %v468_v18, 0.0 }
  0xb6   : > { %v578_v17 = vpack.c.bf16 %v556_v16, %v555_v15 }
  0xb8   : > { %868 = vmatmul.msk.bf16.gmra.mxu3 %vm590_vm3, %v578_v17 }
  0xb9   : > { %v507_v19 = vpop.f32.mrf.mxu2  ;;  %v469_v20 = vpop.f32.mrf.mxu0 }
  0xba   : > { %v470_v22 = vadd.f32 %v1043_v53, %v469_v20  ;;  %v508_v25 = vadd.f32 %v1043_v53, %v507_v19 }
  0xbc   : > { %v542_v23 = vmax.f32 %v470_v22, 0.0  ;;  %v557_v29 = vmax.f32 %v508_v25, 0.0 }
  0xbe   : > { %v571_v24 = vpack.c.bf16 %v542_v23, %v541_v21 }
  0xc0   : > { %861 = vmatmul.msk.bf16.gmra.mxu1 %vm590_vm3, %v571_v24 }
  0xc1   : > { %v509_v26 = vpop.f32.mrf.mxu2  ;;  %v472_v28 = vpop.f32.mrf.mxu0 }
  0xc2   : > { %v510_v27 = vadd.f32 %v1043_v53, %v509_v26  ;;  %v473_v32 = vadd.f32 %v1043_v53, %v472_v28 }
  0xc4   : > { %v558_v30 = vmax.f32 %v510_v27, 0.0  ;;  %v543_v35 = vmax.f32 %v473_v32, 0.0 }
  0xc6   : > { %v579_v31 = vpack.c.bf16 %v558_v30, %v557_v29 }
  0xc8   : > { %869 = vmatmul.msk.bf16.gmra.mxu3 %vm590_vm3, %v579_v31 }
  0xc9   : > { %v512_v33 = vpop.f32.mrf.mxu2  ;;  %v474_v34 = vpop.f32.mrf.mxu0 }
  0xca   : > { %v475_v36 = vadd.f32 %v1043_v53, %v474_v34  ;;  %v513_v39 = vadd.f32 %v1043_v53, %v512_v33 }
  0xcc   : > { %v544_v37 = vmax.f32 %v475_v36, 0.0  ;;  %v559_v43 = vmax.f32 %v513_v39, 0.0 }
  0xce   : > { %v572_v38 = vpack.c.bf16 %v544_v37, %v543_v35 }
  0xd0   : > { %862 = vmatmul.msk.bf16.gmra.mxu1 %vm590_vm3, %v572_v38  ;;  %v1096_v38 = vld [vmem:[%s1208_s5] ss:$0 sm:$0xff] }
  0xd1   : > { %v514_v40 = vpop.f32.mrf.mxu2  ;;  %v477_v42 = vpop.f32.mrf.mxu0 }
  0xd2   : > { %v515_v41 = vadd.f32 %v1043_v53, %v514_v40  ;;  %v478_v46 = vadd.f32 %v1043_v53, %v477_v42 }
  0xd4   : > { %v560_v44 = vmax.f32 %v515_v41, 0.0  ;;  %v545_v49 = vmax.f32 %v478_v46, 0.0 }
  0xd6   : > { %v580_v45 = vpack.c.bf16 %v560_v44, %v559_v43 }
  0xd8   : > { %870 = vmatmul.msk.bf16.gmra.mxu3 %vm590_vm3, %v580_v45 }
  0xd9   : > { %v517_v47 = vpop.f32.mrf.mxu2  ;;  %v479_v48 = vpop.f32.mrf.mxu0 }
  0xda   : > { %v480_v50 = vadd.f32 %v1043_v53, %v479_v48  ;;  %v518_v54 = vadd.f32 %v1043_v53, %v517_v47 }
  0xdc   : > { %v546_v51 = vmax.f32 %v480_v50, 0.0  ;;  %v561_v58 = vmax.f32 %v518_v54, 0.0 }
  0xde   : > { %v573_v52 = vpack.c.bf16 %v546_v51, %v545_v49 }
  0xe0   : > { %863 = vmatmul.msk.bf16.gmra.mxu1 %vm590_vm3, %v573_v52 }
  0xe1   : > { %v519_v55 = vpop.f32.mrf.mxu2  ;;  %v482_v57 = vpop.f32.mrf.mxu0 }
  0xe2   : > { %v520_v56 = vadd.f32 %v1043_v53, %v519_v55  ;;  %v483_v61 = vadd.f32 %v1043_v53, %v482_v57 }
  0xe4   : > { %v562_v59 = vmax.f32 %v520_v56, 0.0  ;;  %v547_v0 = vmax.f32 %v483_v61, 0.0 }
  0xe6   : > { %v581_v60 = vpack.c.bf16 %v562_v59, %v561_v58 }
  0xe8   : > { %871 = vmatmul.msk.bf16.gmra.mxu3 %vm590_vm3, %v581_v60 }
  0xe9   : > { %v522_v62 = vpop.f32.mrf.mxu2  ;;  %v484_v63 = vpop.f32.mrf.mxu0 }
  0xea   : > { %v485_v1 = vadd.f32 %v1043_v53, %v484_v63  ;;  %v523_v4 = vadd.f32 %v1043_v53, %v522_v62 }
  0xec   : > { %v548_v2 = vmax.f32 %v485_v1, 0.0  ;;  %v563_v8 = vmax.f32 %v523_v4, 0.0 }
  0xee   : > { %v574_v3 = vpack.c.bf16 %v548_v2, %v547_v0 }
  0xf0   : > { %864 = vmatmul.msk.bf16.gmra.mxu1 %vm590_vm3, %v574_v3 }
  0xf1   : > { %v524_v5 = vpop.f32.mrf.mxu2  ;;  %v487_v7 = vpop.f32.mrf.mxu0 }
  0xf2   : > { %v525_v6 = vadd.f32 %v1043_v53, %v524_v5  ;;  %v488_v11 = vadd.f32 %v1043_v53, %v487_v7 }
  0xf4   : > { %v564_v9 = vmax.f32 %v525_v6, 0.0  ;;  %v549_v14 = vmax.f32 %v488_v11, 0.0 }
  0xf6   : > { %v582_v10 = vpack.c.bf16 %v564_v9, %v563_v8 }
  0xf8   : > { %872 = vmatmul.msk.bf16.gmra.mxu3 %vm590_vm3, %v582_v10 }
  0xf9   : > { %v527_v12 = vpop.f32.mrf.mxu2  ;;  %v489_v13 = vpop.f32.mrf.mxu0 }
  0xfa   : > { %v490_v15 = vadd.f32 %v1043_v53, %v489_v13  ;;  %v528_v18 = vadd.f32 %v1043_v53, %v527_v12 }
  0xfc   : > { %v550_v16 = vmax.f32 %v490_v15, 0.0  ;;  %v565_v22 = vmax.f32 %v528_v18, 0.0 }
  0xfe   : > { %v575_v17 = vpack.c.bf16 %v550_v16, %v549_v14 }
 0x100   : > { %865 = vmatmul.msk.bf16.gmra.mxu1 %vm590_vm3, %v575_v17 }
 0x101   : > { %v529_v19 = vpop.f32.mrf.mxu2  ;;  %v492_v21 = vpop.f32.mrf.mxu0 }
 0x102   : > { %v530_v20 = vadd.f32 %v1043_v53, %v529_v19  ;;  %v493_v25 = vadd.f32 %v1043_v53, %v492_v21 }
 0x104   : > { %v566_v23 = vmax.f32 %v530_v20, 0.0  ;;  %v551_v28 = vmax.f32 %v493_v25, 0.0 }
 0x106   : > { %v583_v24 = vpack.c.bf16 %v566_v23, %v565_v22 }
 0x108   : > { %873 = vmatmul.msk.bf16.gmra.mxu3 %vm590_vm3, %v583_v24 }
 0x109   : > { %v532_v26 = vpop.f32.mrf.mxu2  ;;  %v494_v27 = vpop.f32.mrf.mxu0 }
 0x10a   : > { %v495_v29 = vadd.f32 %v1043_v53, %v494_v27  ;;  %v533_v32 = vadd.f32 %v1043_v53, %v532_v26 }
 0x10c   : > { %v552_v30 = vmax.f32 %v495_v29, 0.0  ;;  %v567_v35 = vmax.f32 %v533_v32, 0.0 }
 0x10e   : > { %v576_v31 = vpack.c.bf16 %v552_v30, %v551_v28 }
 0x110   : > { %866 = vmatmul.msk.bf16.gmra.mxu1 %vm590_vm3, %v576_v31 }
 0x111   : > { %v534_v33 = vpop.f32.mrf.mxu2 }
 0x112   : > { %v535_v34 = vadd.f32 %v1043_v53, %v534_v33 }
 0x114   : > { %v568_v36 = vmax.f32 %v535_v34, 0.0 }
 0x116   : > { %v584_v37 = vpack.c.bf16 %v568_v36, %v567_v35 }
 0x118   : > { %874 = vmatmul.msk.bf16.gmra.mxu3 %vm590_vm3, %v584_v37 }
 0x11d   : > { %v652_v53 = vpop.f32.mrf.mxu1 }
 0x11e   : > { %v653_v39 = vadd.f32 %v1096_v38, %v652_v53 }
 0x120   : > { %732 = vst.msk [vmem:[%s1102_s17] sm:$0xff] %vm395_vm1, %v653_v39 }
 0x125   : > { %v654_v40 = vpop.f32.mrf.mxu1 }
 0x126   : > { %v655_v41 = vadd.f32 %v1096_v38, %v654_v40 }
 0x128   : > { %733 = vst.msk [vmem:[%s1102_s17 + $0x8] sm:$0xff] %vm395_vm1, %v655_v41 }
 0x12b   : > { %v692_v42 = vpop.f32.mrf.mxu3 }
 0x12c   : > { %v693_v43 = vadd.f32 %v1096_v38, %v692_v42 }
 0x12d   : > { %v657_v44 = vpop.f32.mrf.mxu1 }
 0x12e   : > { %748 = vst.msk [vmem:[%s1102_s17 + $0x80] sm:$0xff] %vm395_vm1, %v693_v43  ;;  %v658_v45 = vadd.f32 %v1096_v38, %v657_v44 }
 0x130   : > { %734 = vst.msk [vmem:[%s1102_s17 + $0x10] sm:$0xff] %vm395_vm1, %v658_v45 }
 0x133   : > { %v694_v46 = vpop.f32.mrf.mxu3 }
 0x134   : > { %v695_v47 = vadd.f32 %v1096_v38, %v694_v46 }
 0x135   : > { %v659_v48 = vpop.f32.mrf.mxu1 }
 0x136   : > { %749 = vst.msk [vmem:[%s1102_s17 + $0x88] sm:$0xff] %vm395_vm1, %v695_v47  ;;  %v660_v49 = vadd.f32 %v1096_v38, %v659_v48 }
 0x138   : > { %735 = vst.msk [vmem:[%s1102_s17 + $0x18] sm:$0xff] %vm395_vm1, %v660_v49 }
 0x13b   : > { %v697_v50 = vpop.f32.mrf.mxu3 }
 0x13c   : > { %v698_v51 = vadd.f32 %v1096_v38, %v697_v50 }
 0x13d   : > { %v662_v52 = vpop.f32.mrf.mxu1 }
 0x13e   : > { %750 = vst.msk [vmem:[%s1102_s17 + $0x90] sm:$0xff] %vm395_vm1, %v698_v51  ;;  %v663_v54 = vadd.f32 %v1096_v38, %v662_v52 }
 0x140   : > { %736 = vst.msk [vmem:[%s1102_s17 + $0x20] sm:$0xff] %vm395_vm1, %v663_v54 }
 0x143   : > { %v699_v55 = vpop.f32.mrf.mxu3 }
 0x144   : > { %v700_v56 = vadd.f32 %v1096_v38, %v699_v55 }
 0x145   : > { %v664_v57 = vpop.f32.mrf.mxu1 }
 0x146   : > { %751 = vst.msk [vmem:[%s1102_s17 + $0x98] sm:$0xff] %vm395_vm1, %v700_v56  ;;  %v665_v58 = vadd.f32 %v1096_v38, %v664_v57 }
 0x148   : > { %737 = vst.msk [vmem:[%s1102_s17 + $0x28] sm:$0xff] %vm395_vm1, %v665_v58 }
 0x14b   : > { %v702_v59 = vpop.f32.mrf.mxu3 }
 0x14c   : > { %v703_v60 = vadd.f32 %v1096_v38, %v702_v59 }
 0x14d   : > { %v667_v61 = vpop.f32.mrf.mxu1 }
 0x14e   : > { %752 = vst.msk [vmem:[%s1102_s17 + $0xa0] sm:$0xff] %vm395_vm1, %v703_v60  ;;  %v668_v62 = vadd.f32 %v1096_v38, %v667_v61 }
 0x150   : > { %738 = vst.msk [vmem:[%s1102_s17 + $0x30] sm:$0xff] %vm395_vm1, %v668_v62 }
 0x153   : > { %v704_v63 = vpop.f32.mrf.mxu3 }
 0x154   : > { %v705_v0 = vadd.f32 %v1096_v38, %v704_v63 }
 0x155   : > { %v669_v1 = vpop.f32.mrf.mxu1 }
 0x156   : > { %753 = vst.msk [vmem:[%s1102_s17 + $0xa8] sm:$0xff] %vm395_vm1, %v705_v0  ;;  %v670_v2 = vadd.f32 %v1096_v38, %v669_v1 }
 0x158   : > { %739 = vst.msk [vmem:[%s1102_s17 + $0x38] sm:$0xff] %vm395_vm1, %v670_v2 }
 0x15b   : > { %v707_v3 = vpop.f32.mrf.mxu3 }
 0x15c   : > { %v708_v4 = vadd.f32 %v1096_v38, %v707_v3 }
 0x15d   : > { %v672_v5 = vpop.f32.mrf.mxu1 }
 0x15e   : > { %754 = vst.msk [vmem:[%s1102_s17 + $0xb0] sm:$0xff] %vm395_vm1, %v708_v4  ;;  %v673_v6 = vadd.f32 %v1096_v38, %v672_v5 }
 0x160   : > { %740 = vst.msk [vmem:[%s1102_s17 + $0x40] sm:$0xff] %vm395_vm1, %v673_v6 }
 0x163   : > { %v709_v7 = vpop.f32.mrf.mxu3 }
 0x164   : > { %v710_v8 = vadd.f32 %v1096_v38, %v709_v7 }
 0x165   : > { %v674_v9 = vpop.f32.mrf.mxu1 }
 0x166   : > { %755 = vst.msk [vmem:[%s1102_s17 + $0xb8] sm:$0xff] %vm395_vm1, %v710_v8  ;;  %v675_v10 = vadd.f32 %v1096_v38, %v674_v9 }
 0x168   : > { %741 = vst.msk [vmem:[%s1102_s17 + $0x48] sm:$0xff] %vm395_vm1, %v675_v10 }
 0x16b   : > { %v712_v11 = vpop.f32.mrf.mxu3 }
 0x16c   : > { %v713_v12 = vadd.f32 %v1096_v38, %v712_v11 }
 0x16d   : > { %v677_v13 = vpop.f32.mrf.mxu1 }
 0x16e   : > { %756 = vst.msk [vmem:[%s1102_s17 + $0xc0] sm:$0xff] %vm395_vm1, %v713_v12  ;;  %v678_v14 = vadd.f32 %v1096_v38, %v677_v13 }
 0x170   : > { %742 = vst.msk [vmem:[%s1102_s17 + $0x50] sm:$0xff] %vm395_vm1, %v678_v14 }
 0x173   : > { %v714_v15 = vpop.f32.mrf.mxu3 }
 0x174   : > { %v715_v16 = vadd.f32 %v1096_v38, %v714_v15 }
 0x175   : > { %v679_v17 = vpop.f32.mrf.mxu1 }
 0x176   : > { %757 = vst.msk [vmem:[%s1102_s17 + $0xc8] sm:$0xff] %vm395_vm1, %v715_v16  ;;  %v680_v18 = vadd.f32 %v1096_v38, %v679_v17 }
 0x178   : > { %743 = vst.msk [vmem:[%s1102_s17 + $0x58] sm:$0xff] %vm395_vm1, %v680_v18 }
 0x17b   : > { %v717_v19 = vpop.f32.mrf.mxu3 }
 0x17c   : > { %v718_v20 = vadd.f32 %v1096_v38, %v717_v19 }
 0x17d   : > { %v682_v21 = vpop.f32.mrf.mxu1 }
 0x17e   : > { %758 = vst.msk [vmem:[%s1102_s17 + $0xd0] sm:$0xff] %vm395_vm1, %v718_v20  ;;  %v683_v22 = vadd.f32 %v1096_v38, %v682_v21 }
 0x180   : > { %744 = vst.msk [vmem:[%s1102_s17 + $0x60] sm:$0xff] %vm395_vm1, %v683_v22 }
 0x183   : > { %v719_v23 = vpop.f32.mrf.mxu3 }
 0x184   : > { %v720_v24 = vadd.f32 %v1096_v38, %v719_v23 }
 0x185   : > { %v684_v25 = vpop.f32.mrf.mxu1 }
 0x186   : > { %759 = vst.msk [vmem:[%s1102_s17 + $0xd8] sm:$0xff] %vm395_vm1, %v720_v24  ;;  %v685_v26 = vadd.f32 %v1096_v38, %v684_v25 }
 0x188   : > { %745 = vst.msk [vmem:[%s1102_s17 + $0x68] sm:$0xff] %vm395_vm1, %v685_v26 }
 0x18b   : > { %v722_v27 = vpop.f32.mrf.mxu3 }
 0x18c   : > { %v723_v28 = vadd.f32 %v1096_v38, %v722_v27 }
 0x18d   : > { %v687_v29 = vpop.f32.mrf.mxu1 }
 0x18e   : > { %760 = vst.msk [vmem:[%s1102_s17 + $0xe0] sm:$0xff] %vm395_vm1, %v723_v28  ;;  %v688_v30 = vadd.f32 %v1096_v38, %v687_v29 }
 0x190   : > { %746 = vst.msk [vmem:[%s1102_s17 + $0x70] sm:$0xff] %vm395_vm1, %v688_v30 }
 0x193   : > { %v724_v31 = vpop.f32.mrf.mxu3 }
 0x194   : > { %v725_v32 = vadd.f32 %v1096_v38, %v724_v31 }
 0x195   : > { %v689_v33 = vpop.f32.mrf.mxu1 }
 0x196   : > { %761 = vst.msk [vmem:[%s1102_s17 + $0xe8] sm:$0xff] %vm395_vm1, %v725_v32  ;;  %v690_v34 = vadd.f32 %v1096_v38, %v689_v33 }
 0x198   : > { %747 = vst.msk [vmem:[%s1102_s17 + $0x78] sm:$0xff] %vm395_vm1, %v690_v34 }
 0x19b   : > { %v727_v35 = vpop.f32.mrf.mxu3 }
 0x19c   : > { %v728_v36 = vadd.f32 %v1096_v38, %v727_v35 }
 0x19e   : > { %762 = vst.msk [vmem:[%s1102_s17 + $0xf0] sm:$0xff] %vm395_vm1, %v728_v36 }
 0x1a3   : > { %v729_v37 = vpop.f32.mrf.mxu3 }
 0x1a4   : > { %v730_v53 = vadd.f32 %v1096_v38, %v729_v37 }
 0x1a6   : > { %763 = vst.msk [vmem:[%s1102_s17 + $0xf8] sm:$0xff] %vm395_vm1, %v730_v53 }
 0x1a7 PF: > { %s16_s21 = sadd.s32 1, %s895_s21  }
 0x1a8   : > { %p13_p4 = scmp.ge.s32.totalorder %s16_s21, 4  }
 0x1aa   :  { %15 = sbr.rel (!%p13_p4) target bundleno = 1 (0x1), region = 77 }

</bundles_post_ra>
